<compile_context>
chip_gen: v7x
topology: tpu7x:2x2x1
jax: 0.10.0
libtpu: 0.0.40
codegen_flags: <defaults>
</compile_context>

<pallas_src>
import math

import jax
import jax.numpy as jnp
from jax.experimental import pallas as pl
from jax.experimental.pallas import tpu as pltpu


def _round_up(v, m):
    return (v + m - 1) // m * m


def _vmem_capacity_bytes():
    """Physical VMEM of the local TPU (64 MiB fallback covers all gens)."""
    try:
        info = pltpu.get_tpu_info()
        cap = getattr(info, "vmem_capacity_bytes", None)
        if cap:
            return int(cap)
    except Exception:
        pass
    return 64 * 1024 * 1024


def _pad_cast(a, shape, dtype):
    """Zero-pad + cast, skipping the extra HBM pass when already done."""
    if a.shape == tuple(shape):
        return a if a.dtype == dtype else a.astype(dtype)
    out = jnp.zeros(shape, dtype)
    return out.at[tuple(slice(0, s) for s in a.shape)].set(a.astype(dtype))


def _select_tiles(n_p, f_in_p, f_out_p, itemsize, out_itemsize, budget):
    """Pick (tm, tk, x_resident) that fits `budget` bytes of VMEM."""
    x_res_bytes = 2 * n_p * f_in_p * itemsize           # resident x (2 bufs)
    w_bytes = 2 * f_in_p * f_out_p * itemsize            # W (2 bufs)
    b_bytes = 2 * 128 * 4                                 # bias row (padded)
    x_resident = (x_res_bytes + w_bytes) <= budget // 2

    def fits(tm, tk, resident):
        adj = 2 * tm * tk * itemsize                      # adj tile, 2 bufs
        out = 2 * tm * f_out_p * out_itemsize             # out tile, 2 bufs
        acc = tm * f_in_p * 4                             # f32 accumulator
        xb = x_res_bytes if resident else 2 * tk * f_in_p * itemsize
        return adj + out + acc + xb + w_bytes + b_bytes <= budget

    tm_cands = [t for t in (512, 256, 128) if n_p % t == 0]
    # Keep >= 2 row tiles when the graph allows it (both v7x TensorCores).
    multi = [t for t in tm_cands if n_p // t >= 2]
    if multi:
        tm_cands = multi
    for tm in tm_cands:
        for tk in (2048, 1024, 512, 256, 128):
            if n_p % tk:
                continue
            if fits(tm, tk, x_resident):
                return tm, tk, x_resident
    return 128, 128, False


def _gcn_kernel(adj_ref, x_ref, w_ref, b_ref, o_ref, acc_ref):
    k = pl.program_id(1)
    tk = adj_ref.shape[1]

    @pl.when(k == 0)
    def _init():
        acc_ref[...] = jnp.zeros_like(acc_ref)

    if x_ref.shape[0] == tk:
        # Streamed k-panel (fallback path): the whole block is the panel.
        x_panel = x_ref[...]
    else:
        # Resident x: slice the current k-panel out of the single VMEM copy.
        start = pl.multiple_of(k * tk, 128)
        x_panel = x_ref[pl.ds(start, tk), :]

    # acc += adj_tile @ x_panel : (TM, TK) @ (TK, F_in_p) -> (TM, F_in_p)
    acc_ref[...] += jnp.dot(
        adj_ref[...], x_panel, preferred_element_type=jnp.float32
    )

    @pl.when(k == pl.num_programs(1) - 1)
    def _epilogue():
        # Project to F_out (bf16 MXU inputs, f32 accumulate) + bias, once.
        proj = jnp.dot(
            acc_ref[...].astype(w_ref.dtype), w_ref[...],
            preferred_element_type=jnp.float32,
        )
        o_ref[...] = (proj + b_ref[...]).astype(o_ref.dtype)


def graph_convolution(x, weight, adj, bias, *,
                      compute_dtype=jnp.bfloat16, out_dtype=jnp.float32):
    """output = adj @ (x @ weight) + bias  (computed as (adj @ x) @ weight + bias)."""
    n, f_in = x.shape
    f_out = weight.shape[1]

    n_p = _round_up(n, 128)
    f_in_p = _round_up(f_in, 128)
    f_out_p = _round_up(f_out, 128)

    itemsize = jnp.dtype(compute_dtype).itemsize
    out_itemsize = jnp.dtype(out_dtype).itemsize

    # Generation-aware VMEM budget: 128 MiB physical on v5e/v6e, 64 MiB on v7x.
    cap = _vmem_capacity_bytes()
    budget = min(int(cap * 0.75), 96 * 1024 * 1024)
    vmem_limit = min(max(int(cap * 0.9), 32 * 1024 * 1024), 112 * 1024 * 1024)

    tm, tk, x_resident = _select_tiles(
        n_p, f_in_p, f_out_p, itemsize, out_itemsize, budget)

    # adj / x in compute_dtype (bf16 default: halves the dominant HBM stream,
    # full-rate MXU).  W also in compute_dtype (fast epilogue matmul).  Bias
    # and accumulator stay f32.  Pre-padded / pre-cast operands pass through
    # untouched (no extra HBM copy).
    adj_p = _pad_cast(adj, (n_p, n_p), compute_dtype)
    x_p = _pad_cast(x, (n_p, f_in_p), compute_dtype)
    w_p = _pad_cast(weight, (f_in_p, f_out_p), compute_dtype)
    b_p = _pad_cast(bias.reshape(1, -1), (1, f_out_p), jnp.float32)

    grid = (n_p // tm, n_p // tk)

    if x_resident:
        x_spec = pl.BlockSpec((n_p, f_in_p), lambda i, k: (0, 0))   # one DMA
        x_bytes = n_p * f_in_p * itemsize
    else:
        x_spec = pl.BlockSpec((tk, f_in_p), lambda i, k: (k, 0))    # re-streamed
        x_bytes = grid[0] * n_p * f_in_p * itemsize

    cost = pl.CostEstimate(
        flops=2 * n_p * n_p * f_in_p + 2 * n_p * f_in_p * f_out_p,
        transcendentals=0,
        bytes_accessed=(
            n_p * n_p * itemsize              # adj (dominant stream)
            + x_bytes                         # x
            + f_in_p * f_out_p * itemsize     # W
            + f_out_p * 4                     # bias
            + n_p * f_out_p * out_itemsize    # output
        ),
    )

    out_p = pl.pallas_call(
        _gcn_kernel,
        out_shape=jax.ShapeDtypeStruct((n_p, f_out_p), out_dtype),
        grid_spec=pltpu.PrefetchScalarGridSpec(
            num_scalar_prefetch=0,
            grid=grid,
            in_specs=[
                pl.BlockSpec((tm, tk), lambda i, k: (i, k)),           # adj tile
                x_spec,                                                # x (resident or panel)
                pl.BlockSpec((f_in_p, f_out_p), lambda i, k: (0, 0)),  # W (resident)
                pl.BlockSpec((1, f_out_p), lambda i, k: (0, 0)),       # bias (resident)
            ],
            out_specs=pl.BlockSpec((tm, f_out_p), lambda i, k: (i, 0)),
            scratch_shapes=[pltpu.VMEM((tm, f_in_p), jnp.float32)],
        ),
        compiler_params=pltpu.CompilerParams(
            dimension_semantics=("parallel", "arbitrary"),
            vmem_limit_bytes=vmem_limit,
        ),
        cost_estimate=cost,
    )(adj_p, x_p, w_p, b_p)

    return out_p[:n, :f_out]


def xavier_uniform(key, shape, dtype=jnp.float32):
    # Matches nn.init.xavier_uniform_ (gain=1): U(-a, a), a = sqrt(6/(fan_in+fan_out))
    fan_in, fan_out = shape
    a = math.sqrt(6.0 / (fan_in + fan_out))
    return jax.random.uniform(key, shape, dtype=dtype, minval=-a, maxval=a)


if __name__ == "__main__":
    # Small shapes consistent with the module: N nodes, in/out feature dims.
    N, F_IN, F_OUT = 64, 32, 128

    key = jax.random.PRNGKey(0)
    k_x, k_adj, k_w = jax.random.split(key, 3)

    x = jax.random.normal(k_x, (N, F_IN), dtype=jnp.float32)
    # Dense (row-normalized) adjacency; torch.spmm(adj_dense, m) == adj_dense @ m.
    adj_raw = jax.random.uniform(k_adj, (N, N), dtype=jnp.float32)
    adj = adj_raw / jnp.sum(adj_raw, axis=1, keepdims=True)

    # Deterministic parameter init, mirroring reset_parameters():
    weight = xavier_uniform(k_w, (F_IN, F_OUT))        # xavier_uniform_
    bias = jnp.zeros((F_OUT,), dtype=jnp.float32)      # zeros_

    ref = adj @ (x @ weight) + bias

    # f32 path: tight check of the tiled accumulation + epilogue logic.
    out_f32 = jax.block_until_ready(
        graph_convolution(x, weight, adj, bias, compute_dtype=jnp.float32))
    assert out_f32.shape == (N, F_OUT)
    assert jnp.allclose(out_f32, ref, atol=1e-4, rtol=1e-4)

    # bf16 MXU-input path (f32 accumulation): the performance configuration.
    out_bf16 = jax.block_until_ready(
        graph_convolution(x, weight, adj, bias, compute_dtype=jnp.bfloat16))
    assert out_bf16.shape == (N, F_OUT)
    assert jnp.allclose(out_bf16, ref, atol=2e-2, rtol=2e-2)

    print("KERNEL_OK")
</pallas_src>

<mosaic_0001>
module attributes {stable_mosaic.version = 11 : i64} {
  func.func @_gcn_kernel(%arg0: i32, %arg1: i32, %arg2: memref<128x128xf32, #tpu.memory_space<vmem>>, %arg3: memref<128x128xf32, #tpu.memory_space<vmem>>, %arg4: memref<128x128xf32, #tpu.memory_space<vmem>>, %arg5: memref<1x128xf32, #tpu.memory_space<vmem>>, %arg6: memref<128x128xf32, #tpu.memory_space<vmem>>, %arg7: memref<128x128xf32, #tpu.memory_space<vmem>>) attributes {dimension_semantics = [#tpu.dimension_semantics<parallel>, #tpu.dimension_semantics<arbitrary>], iteration_bounds = array<i64: 1, 1>, scalar_prefetch = 0 : i64, scratch_operands = 1 : i64, tpu.core_type = #tpu.core_type<tc>, window_params = [{transform_indices = @transform_0, window_bounds = array<i64: 128, 128>}, {pipeline_mode = #tpu.pipeline_mode<synchronous>, transform_indices = @transform_1, window_bounds = array<i64: 128, 128>}, {pipeline_mode = #tpu.pipeline_mode<synchronous>, transform_indices = @transform_2, window_bounds = array<i64: 128, 128>}, {pipeline_mode = #tpu.pipeline_mode<synchronous>, transform_indices = @transform_3, window_bounds = array<i64: 1, 128>}, {transform_indices = @transform_4, window_bounds = array<i64: 128, 128>}]} {
    %c0_i32 = arith.constant 0 : i32
    %0 = arith.cmpi eq, %arg1, %c0_i32 : i32
    %1 = arith.extui %0 : i1 to i32
    %c0_i32_0 = arith.constant 0 : i32
    %2 = arith.cmpi ne, %1, %c0_i32_0 : i32
    scf.if %2 {
      %cst_10 = arith.constant 0.000000e+00 : f32
      %12 = vector.broadcast %cst_10 : f32 to vector<128x128xf32>
      %c0_11 = arith.constant 0 : index
      %c0_12 = arith.constant 0 : index
      %13 = vector.load %arg7[%c0_11, %c0_12] : memref<128x128xf32, #tpu.memory_space<vmem>>, vector<128x128xf32>
      tpu.vector_store %arg7[%c0_11, %c0_12], %12 {strides = array<i32>} : memref<128x128xf32, #tpu.memory_space<vmem>>, vector<128x128xf32>,
    } else {
    }
    %c0 = arith.constant 0 : index
    %c0_1 = arith.constant 0 : index
    %3 = vector.load %arg3[%c0, %c0_1] : memref<128x128xf32, #tpu.memory_space<vmem>>, vector<128x128xf32>
    %c0_2 = arith.constant 0 : index
    %c0_3 = arith.constant 0 : index
    %4 = vector.load %arg7[%c0_2, %c0_3] : memref<128x128xf32, #tpu.memory_space<vmem>>, vector<128x128xf32>
    %c0_4 = arith.constant 0 : index
    %c0_5 = arith.constant 0 : index
    %5 = vector.load %arg2[%c0_4, %c0_5] : memref<128x128xf32, #tpu.memory_space<vmem>>, vector<128x128xf32>
    %cst = arith.constant dense<0.000000e+00> : vector<128x128xf32>
    %6 = tpu.matmul %5, %3, %cst {dimension_numbers = #tpu.dot_dimension_numbers<[1], [0], [0], [1], [0, 0, 1, 1], [], []>} : vector<128x128xf32>, vector<128x128xf32>, vector<128x128xf32> -> vector<128x128xf32>
    %7 = arith.addf %4, %6 : vector<128x128xf32>
    %c0_6 = arith.constant 0 : index
    %c0_7 = arith.constant 0 : index
    %8 = vector.load %arg7[%c0_6, %c0_7] : memref<128x128xf32, #tpu.memory_space<vmem>>, vector<128x128xf32>
    tpu.vector_store %arg7[%c0_6, %c0_7], %7 {strides = array<i32>} : memref<128x128xf32, #tpu.memory_space<vmem>>, vector<128x128xf32>,
    %c0_i32_8 = arith.constant 0 : i32
    %9 = arith.cmpi eq, %arg1, %c0_i32_8 : i32
    %10 = arith.extui %9 : i1 to i32
    %c0_i32_9 = arith.constant 0 : i32
    %11 = arith.cmpi ne, %10, %c0_i32_9 : i32
    scf.if %11 {
      %c0_10 = arith.constant 0 : index
      %c0_11 = arith.constant 0 : index
      %12 = vector.load %arg7[%c0_10, %c0_11] : memref<128x128xf32, #tpu.memory_space<vmem>>, vector<128x128xf32>
      %c0_12 = arith.constant 0 : index
      %c0_13 = arith.constant 0 : index
      %13 = vector.load %arg4[%c0_12, %c0_13] : memref<128x128xf32, #tpu.memory_space<vmem>>, vector<128x128xf32>
      %cst_14 = arith.constant dense<0.000000e+00> : vector<128x128xf32>
      %14 = tpu.matmul %12, %13, %cst_14 {dimension_numbers = #tpu.dot_dimension_numbers<[1], [0], [0], [1], [0, 0, 1, 1], [], []>} : vector<128x128xf32>, vector<128x128xf32>, vector<128x128xf32> -> vector<128x128xf32>
      %c0_15 = arith.constant 0 : index
      %c0_16 = arith.constant 0 : index
      %15 = vector.load %arg5[%c0_15, %c0_16] : memref<1x128xf32, #tpu.memory_space<vmem>>, vector<1x128xf32>
      %16 = vector.broadcast %15 : vector<1x128xf32> to vector<128x128xf32>
      %17 = arith.addf %14, %16 : vector<128x128xf32>
      %c0_17 = arith.constant 0 : index
      %c0_18 = arith.constant 0 : index
      %18 = vector.load %arg6[%c0_17, %c0_18] : memref<128x128xf32, #tpu.memory_space<vmem>>, vector<128x128xf32>
      tpu.vector_store %arg6[%c0_17, %c0_18], %17 {strides = array<i32>} : memref<128x128xf32, #tpu.memory_space<vmem>>, vector<128x128xf32>,
    } else {
    }
    return
  }
  func.func @transform_0(%arg0: i32, %arg1: i32) -> (i32, i32) {
    %c0_i32 = arith.constant 0 : i32
    return %arg0, %arg1 : i32, i32
  }
  func.func @transform_1(%arg0: i32, %arg1: i32) -> (i32, i32) {
    %c0_i32 = arith.constant 0 : i32
    %c0_i32_0 = arith.constant 0 : i32
    %c0_i32_1 = arith.constant 0 : i32
    return %c0_i32, %c0_i32_0 : i32, i32
  }
  func.func @transform_2(%arg0: i32, %arg1: i32) -> (i32, i32) {
    %c0_i32 = arith.constant 0 : i32
    %c0_i32_0 = arith.constant 0 : i32
    %c0_i32_1 = arith.constant 0 : i32
    return %c0_i32, %c0_i32_0 : i32, i32
  }
  func.func @transform_3(%arg0: i32, %arg1: i32) -> (i32, i32) {
    %c0_i32 = arith.constant 0 : i32
    %c0_i32_0 = arith.constant 0 : i32
    %c0_i32_1 = arith.constant 0 : i32
    return %c0_i32, %c0_i32_0 : i32, i32
  }
  func.func @transform_4(%arg0: i32, %arg1: i32) -> (i32, i32) {
    %c0_i32 = arith.constant 0 : i32
    %c0_i32_0 = arith.constant 0 : i32
    return %arg0, %c0_i32 : i32, i32
  }
}

</mosaic_0001>

<bundles_post_ra>
// kernel: tpu_custom_call.1
= control target key start
LH: loop header
LB: loop body
LE: loop exit
PB: predicated region body
PF: predicated region fallthrough
CT: control target
= control target key end

     0   :  { %9 = vsyncpa [#allocation4], 0  ;;  %s967_s0 = inlined_call_operand.hbm [shape: f32[128,128], index: 0, kind: input, shape index: {}]   ;;  %s968_s1 = inlined_call_operand.hbm [shape: f32[128,128], index: 1, kind: input, shape index: {}]   ;;  %s969_s2 = inlined_call_operand.hbm [shape: f32[128,128], index: 2, kind: input, shape index: {}]   ;;  %s970_s3 = inlined_call_operand.vmem [shape: f32[1,128], index: 3, kind: input, shape index: {}]   ;;  %s971_s4 = inlined_call_operand.hbm [shape: f32[128,128], index: 4, kind: output, shape index: {}]  }
   0x1   :  { %10 = vsyncpa [#allocation7], 0 }
   0x2   :  { %11 = vsyncpa [#allocation5], 0  ;;  %s866_s15 = smov [#allocation6]   ;;  %s867_s17 = smov [#allocation3]  }
   0x3   :  { %s29_s16 = sshll.u32 %s866_s15, 4  ;;  %s17_s18 = sshll.u32 %s867_s17, 4  ;;  %s30_s16 = int_to_ptr.vmem [resolvable:$true] %s29_s16  ;;  %s897_s18 = int_to_ptr.vmem [resolvable:$true] %s17_s18 }
   0x4   :  { %s772_s21 = scalar_lea.hbm %s968_s1, 2048 }
   0x5   :  { %p773_p0 = scmp.ne.s32.totalorder %s968_s1, %s772_s21  ;;  %p776_p1 = scmp.lt.u32.totalorder %s772_s21, %s968_s1 }
   0x7   :  { %p778_p2 = pnand %p776_p1, %p773_p0 }
   0x9   :  { %781 = shalt.err (!%p778_p2)
}
   0xa   :  { %s782_s26 = scalar_lea.vmem %s30_s16, 2048  ;;  %p787_p4 = scmp.lt.s32.totalorder %s30_s16, %s30_s16 }
   0xb   :  { %p783_p3 = scmp.ne.s32.totalorder %s30_s16, %s782_s26  ;;  %p788_p5 = scmp.lt.s32.totalorder %s782_s26, %s782_s26 }
   0xd   :  { %p789_p6 = por %p788_p5, %p787_p4 }
   0xf   :  { %p790_p7 = pnand %p789_p6, %p783_p3 }
  0x11   :  { %793 = shalt.err (!%p790_p7)
}
  0x12   :  { %s868_s27 = smov 128   ;;  %s869_s28 = smov 8  }
  0x13   :  { %35 = dma.hbm_to_vmem [thread:$0]  %s968_s1, 2048, %s30_s16, [#allocation7], %s868_s27, %s868_s27, %s869_s28  }
  0x14   :  { %s794_s7 = scalar_lea.hbm %s967_s0, 2048 }
  0x15   :  { %p795_p8 = scmp.ne.s32.totalorder %s967_s0, %s794_s7  ;;  %p798_p9 = scmp.lt.u32.totalorder %s794_s7, %s967_s0 }
  0x17   :  { %p800_p10 = pnand %p798_p9, %p795_p8 }
  0x19   :  { %803 = shalt.err (!%p800_p10)
}
  0x1a   :  { %s804_s12 = scalar_lea.vmem %s897_s18, 2048  ;;  %p809_p12 = scmp.lt.s32.totalorder %s897_s18, %s897_s18 }
  0x1b   :  { %p805_p11 = scmp.ne.s32.totalorder %s897_s18, %s804_s12  ;;  %p810_p13 = scmp.lt.s32.totalorder %s804_s12, %s804_s12 }
  0x1d   :  { %p811_p0 = por %p810_p13, %p809_p12 }
  0x1f   :  { %p812_p1 = pnand %p811_p0, %p805_p11 }
  0x21   :  { %815 = shalt.err (!%p812_p1)
}
  0x22   :  { %23 = dma.hbm_to_vmem [thread:$0]  %s967_s0, 2048, %s897_s18, [#allocation4], %s868_s27, %s868_s27, %s869_s28  }
  0x23   :  { %s870_s14 = smov [#allocation8]   ;;  %s816_s19 = scalar_lea.hbm %s969_s2, 2048 }
  0x24   :  { %s41_s15 = sshll.u32 %s870_s14, 4  ;;  %p817_p2 = scmp.ne.s32.totalorder %s969_s2, %s816_s19  ;;  %s42_s15 = int_to_ptr.vmem [resolvable:$true] %s41_s15 }
  0x25   :  { %p820_p3 = scmp.lt.u32.totalorder %s816_s19, %s969_s2 }
  0x27   :  { %p822_p4 = pnand %p820_p3, %p817_p2 }
  0x29   :  { %825 = shalt.err (!%p822_p4)
}
  0x2a   :  { %s826_s24 = scalar_lea.vmem %s42_s15, 2048  ;;  %p831_p6 = scmp.lt.s32.totalorder %s42_s15, %s42_s15 }
  0x2b   :  { %p827_p5 = scmp.ne.s32.totalorder %s42_s15, %s826_s24  ;;  %p832_p7 = scmp.lt.s32.totalorder %s826_s24, %s826_s24 }
  0x2d   :  { %p833_p8 = por %p832_p7, %p831_p6 }
  0x2f   :  { %p834_p9 = pnand %p833_p8, %p827_p5 }
  0x31   :  { %837 = shalt.err (!%p834_p9)
}
  0x32   :  { %47 = dma.hbm_to_vmem [thread:$0]  %s969_s2, 2048, %s42_s15, [#allocation7], %s868_s27, %s868_s27, %s869_s28  }
  0x33   :  { %860 = dma.done.wait [#allocation4], 2048  }
  0x34   :  { %861 = vsyncadd [#allocation4], 4294965248 }
  0x35   :  { %862 = dma.done.wait [#allocation7], 4096  }
  0x36   :  { %863 = vsyncadd [#allocation7], 4294963200  ;;  %v79_v0 = vld [vmem:[#allocation6] sm:$0xff]  ;;  %v80_v1 = vld [vmem:[#allocation6 + $0x8] sm:$0xff] }
  0x37   :  { %v81_v2 = vld [vmem:[#allocation6 + $0x10] sm:$0xff]  ;;  %v702_v3 = vpack.c.bf16 %v80_v1, %v79_v0  ;;  %v82_v4 = vld [vmem:[#allocation6 + $0x18] sm:$0xff]  ;;  %v83_v6 = vld [vmem:[#allocation6 + $0x20] sm:$0xff] }
  0x38   :  { %v706_v5 = vpack.c.bf16 %v82_v4, %v81_v2  ;;  %v84_v7 = vld [vmem:[#allocation6 + $0x28] sm:$0xff]  ;;  %v111_v9 = vld [vmem:[#allocation3] sm:$0xff]  ;;  %v85_v10 = vld [vmem:[#allocation6 + $0x30] sm:$0xff] }
  0x39   :  { %703 = vmatprep.subr.bf16.mxu0 %v702_v3  ;;  %v710_v8 = vpack.c.bf16 %v84_v7, %v83_v6  ;;  %v86_v11 = vld [vmem:[#allocation6 + $0x38] sm:$0xff]  ;;  %622 = vmatprep.mubr.f32.mxu0 %v111_v9  ;;  %v87_v13 = vld [vmem:[#allocation6 + $0x40] sm:$0xff]  ;;  %v88_v14 = vld [vmem:[#allocation6 + $0x48] sm:$0xff] }
  0x3a   :  { %705 = vmatpush3.bf16.msra.mxu0 %v702_v3  ;;  %v714_v12 = vpack.c.bf16 %v86_v11, %v85_v10  ;;  %v323_v15 = vld [vmem:[#allocation8] sm:$0xff]  ;;  %v324_v16 = vld [vmem:[#allocation8 + $0x8] sm:$0xff]  ;;  %v325_v17 = vld [vmem:[#allocation8 + $0x10] sm:$0xff]  ;;  %v718_v21 = vpack.c.bf16 %v88_v14, %v87_v13 }
  0x3b   :  { %707 = vmatprep.subr.bf16.mxu0 %v706_v5  ;;  %v326_v18 = vld [vmem:[#allocation8 + $0x18] sm:$0xff]  ;;  %v734_v19 = vpack.c.bf16 %v324_v16, %v323_v15  ;;  %v327_v22 = vld [vmem:[#allocation8 + $0x20] sm:$0xff]  ;;  %v328_v23 = vld [vmem:[#allocation8 + $0x28] sm:$0xff] }
  0x3c   :  { %v738_v20 = vpack.c.bf16 %v326_v18, %v325_v17  ;;  %v89_v24 = vld [vmem:[#allocation6 + $0x50] sm:$0xff]  ;;  %v90_v25 = vld [vmem:[#allocation6 + $0x58] sm:$0xff]  ;;  %v742_v26 = vpack.c.bf16 %v328_v23, %v327_v22  ;;  %v91_v30 = vld [vmem:[#allocation6 + $0x60] sm:$0xff] }
  0x3d   :  { %735 = vmatprep.subr.bf16.mxu1 %v734_v19  ;;  %v722_v27 = vpack.c.bf16 %v90_v25, %v89_v24  ;;  %v329_v28 = vld [vmem:[#allocation8 + $0x30] sm:$0xff]  ;;  %v330_v29 = vld [vmem:[#allocation8 + $0x38] sm:$0xff]  ;;  %v92_v31 = vld [vmem:[#allocation6 + $0x68] sm:$0xff] }
  0x3e   :  { %709 = vmatpush3.bf16.msra.mxu0 %v706_v5  ;;  %737 = vmatpush3.bf16.msra.mxu1 %v734_v19  ;;  %v746_v32 = vpack.c.bf16 %v330_v29, %v329_v28  ;;  %v726_v33 = vpack.c.bf16 %v92_v31, %v91_v30  ;;  %v331_v34 = vld [vmem:[#allocation8 + $0x40] sm:$0xff]  ;;  %v332_v35 = vld [vmem:[#allocation8 + $0x48] sm:$0xff]  ;;  %v93_v36 = vld [vmem:[#allocation6 + $0x70] sm:$0xff] }
  0x3f   :  { %711 = vmatprep.subr.bf16.mxu0 %v710_v8  ;;  %739 = vmatprep.subr.bf16.mxu1 %v738_v20  ;;  %v94_v37 = vld [vmem:[#allocation6 + $0x78] sm:$0xff]  ;;  %v750_v38 = vpack.c.bf16 %v332_v35, %v331_v34  ;;  %v333_v40 = vld [vmem:[#allocation8 + $0x50] sm:$0xff]  ;;  %v335_v43 = vld [vmem:[#allocation8 + $0x60] sm:$0xff] }
  0x40   :  { %v730_v39 = vpack.c.bf16 %v94_v37, %v93_v36  ;;  %v334_v41 = vld [vmem:[#allocation8 + $0x58] sm:$0xff]  ;;  %v336_v44 = vld [vmem:[#allocation8 + $0x68] sm:$0xff]  ;;  %v113_v47 = vld [vmem:[#allocation3 + $0x10] sm:$0xff] }
  0x41   :  { %v754_v42 = vpack.c.bf16 %v334_v41, %v333_v40  ;;  %v112_v45 = vld [vmem:[#allocation3 + $0x8] sm:$0xff]  ;;  %v758_v46 = vpack.c.bf16 %v336_v44, %v335_v43  ;;  %v337_v48 = vld [vmem:[#allocation8 + $0x70] sm:$0xff]  ;;  %v338_v49 = vld [vmem:[#allocation8 + $0x78] sm:$0xff] }
  0x42   :  { %713 = vmatpush3.bf16.msra.mxu0 %v710_v8  ;;  %741 = vmatpush3.bf16.msra.mxu1 %v738_v20  ;;  %v114_v50 = vld [vmem:[#allocation3 + $0x18] sm:$0xff]  ;;  %v762_v51 = vpack.c.bf16 %v338_v49, %v337_v48  ;;  %v115_v52 = vld [vmem:[#allocation3 + $0x20] sm:$0xff]  ;;  %v116_v53 = vld [vmem:[#allocation3 + $0x28] sm:$0xff] }
  0x43   :  { %715 = vmatprep.subr.bf16.mxu0 %v714_v12  ;;  %743 = vmatprep.subr.bf16.mxu1 %v742_v26  ;;  %v117_v54 = vld [vmem:[#allocation3 + $0x30] sm:$0xff]  ;;  %v118_v55 = vld [vmem:[#allocation3 + $0x38] sm:$0xff]  ;;  %v119_v56 = vld [vmem:[#allocation3 + $0x40] sm:$0xff] }
  0x44   :  { %v120_v57 = vld [vmem:[#allocation3 + $0x48] sm:$0xff]  ;;  %v121_v58 = vld [vmem:[#allocation3 + $0x50] sm:$0xff]  ;;  %v122_v59 = vld [vmem:[#allocation3 + $0x58] sm:$0xff] }
  0x45   :  { %v123_v60 = vld [vmem:[#allocation3 + $0x60] sm:$0xff]  ;;  %v124_v61 = vld [vmem:[#allocation3 + $0x68] sm:$0xff]  ;;  %v125_v62 = vld [vmem:[#allocation3 + $0x70] sm:$0xff] }
  0x46   :  { %717 = vmatpush3.bf16.msra.mxu0 %v714_v12  ;;  %745 = vmatpush3.bf16.msra.mxu1 %v742_v26  ;;  %v126_v63 = vld [vmem:[#allocation3 + $0x78] sm:$0xff]  ;;  %v525_v16 = vld [vmem:[%s970_s3] ss:$0 sm:$0xff]  ;;  %s871_s3 = smov [#allocation9]  }
  0x47   :  { %719 = vmatprep.subr.bf16.mxu0 %v718_v21  ;;  %747 = vmatprep.subr.bf16.mxu1 %v746_v32  ;;  %s512_s26 = sshll.u32 %s871_s3, 4  ;;  %s513_s26 = int_to_ptr.vmem [resolvable:$true] %s512_s26 }
  0x48   :  { %s838_s29 = scalar_lea.vmem %s513_s26, 2048  ;;  %p843_p11 = scmp.lt.s32.totalorder %s513_s26, %s513_s26 }
  0x49   :  { %p839_p10 = scmp.ne.s32.totalorder %s513_s26, %s838_s29  ;;  %p844_p12 = scmp.lt.s32.totalorder %s838_s29, %s838_s29 }
  0x4a   :  { %721 = vmatpush3.bf16.msra.mxu0 %v718_v21  ;;  %749 = vmatpush3.bf16.msra.mxu1 %v746_v32 }
  0x4b   :  { %723 = vmatprep.subr.bf16.mxu0 %v722_v27  ;;  %751 = vmatprep.subr.bf16.mxu1 %v750_v38  ;;  %p845_p13 = por %p844_p12, %p843_p11 }
  0x4d   :  { %p846_p0 = pnand %p845_p13, %p839_p10 }
  0x4e   :  { %725 = vmatpush3.bf16.msra.mxu0 %v722_v27  ;;  %753 = vmatpush3.bf16.msra.mxu1 %v750_v38 }
  0x4f   :  { %727 = vmatprep.subr.bf16.mxu0 %v726_v33  ;;  %755 = vmatprep.subr.bf16.mxu1 %v754_v42 }
  0x52   :  { %729 = vmatpush3.bf16.msra.mxu0 %v726_v33  ;;  %757 = vmatpush3.bf16.msra.mxu1 %v754_v42 }
  0x53   :  { %731 = vmatprep.subr.bf16.mxu0 %v730_v39  ;;  %759 = vmatprep.subr.bf16.mxu1 %v758_v46 }
  0x56   :  { %733 = vmatpush3.bf16.msra.mxu0 %v730_v39  ;;  %761 = vmatpush3.bf16.msra.mxu1 %v758_v46 }
  0x57   :  { %763 = vmatprep.subr.bf16.mxu1 %v762_v51 }
  0x59   :  { %623 = vmatmul.mubr.f32.vlgmr.msra.gmra.mrb[0].mxu0 %v112_v45 }
  0x5a   :  { %625 = vmatprep.mubr.f32.mxu0 %v113_v47  ;;  %765 = vmatpush3.bf16.msra.mxu1 %v762_v51 }
  0x5d   :  { %626 = vmatmul.mubr.f32.gmra.mrb[2].mxu0 %v114_v50 }
  0x5e   :  { %628 = vmatprep.mubr.f32.mxu0 %v115_v52 }
  0x61   :  { %629 = vmatmul.mubr.f32.gmra.mrb[4].mxu0 %v116_v53 }
  0x62   :  { %631 = vmatprep.mubr.f32.mxu0 %v117_v54 }
  0x65   :  { %632 = vmatmul.mubr.f32.gmra.mrb[6].mxu0 %v118_v55 }
  0x66   :  { %634 = vmatprep.mubr.f32.mxu0 %v119_v56 }
  0x69   :  { %635 = vmatmul.mubr.f32.gmra.mrb[8].mxu0 %v120_v57 }
  0x6a   :  { %637 = vmatprep.mubr.f32.mxu0 %v121_v58 }
  0x6d   :  { %638 = vmatmul.mubr.f32.gmra.mrb[10].mxu0 %v122_v59 }
  0x6e   :  { %640 = vmatprep.mubr.f32.mxu0 %v123_v60 }
  0x71   :  { %641 = vmatmul.mubr.f32.gmra.mrb[12].mxu0 %v124_v61 }
  0x72   :  { %643 = vmatprep.mubr.f32.mxu0 %v125_v62 }
  0x75   :  { %644 = vmatmul.mubr.f32.gmra.mrb[14].mxu0 %v126_v63 }
 0x12c   :  { %v624_v0 = vpop.f32.mrb[0].mxu0 }
 0x12d   :  { %v193_v1 = vpop.f32.mrb[1].mxu0 }
 0x12e   :  { %678 = vmatprep.mubr.f32.mxu1 %v193_v1 }
 0x12f   :  { %679 = vmatmul.mubr.f32.vlgmr.msra.gmra.mrb[0].mxu1 %v624_v0 }
 0x130   :  { %v627_v2 = vpop.f32.mrb[2].mxu0 }
 0x131   :  { %v203_v3 = vpop.f32.mrb[3].mxu0 }
 0x132   :  { %681 = vmatprep.mubr.f32.mxu1 %v203_v3 }
 0x133   :  { %682 = vmatmul.mubr.f32.gmra.mrb[2].mxu1 %v627_v2 }
 0x134   :  { %v630_v4 = vpop.f32.mrb[4].mxu0 }
 0x135   :  { %v213_v5 = vpop.f32.mrb[5].mxu0 }
 0x136   :  { %684 = vmatprep.mubr.f32.mxu1 %v213_v5 }
 0x137   :  { %685 = vmatmul.mubr.f32.gmra.mrb[4].mxu1 %v630_v4 }
 0x138   :  { %v633_v6 = vpop.f32.mrb[6].mxu0 }
 0x139   :  { %v223_v7 = vpop.f32.mrb[7].mxu0 }
 0x13a   :  { %687 = vmatprep.mubr.f32.mxu1 %v223_v7 }
 0x13b   :  { %688 = vmatmul.mubr.f32.gmra.mrb[6].mxu1 %v633_v6 }
 0x13c   :  { %v636_v8 = vpop.f32.mrb[8].mxu0 }
 0x13d   :  { %v233_v9 = vpop.f32.mrb[9].mxu0 }
 0x13e   :  { %690 = vmatprep.mubr.f32.mxu1 %v233_v9 }
 0x13f   :  { %691 = vmatmul.mubr.f32.gmra.mrb[8].mxu1 %v636_v8 }
 0x140   :  { %v639_v10 = vpop.f32.mrb[10].mxu0 }
 0x141   :  { %v243_v11 = vpop.f32.mrb[11].mxu0 }
 0x142   :  { %693 = vmatprep.mubr.f32.mxu1 %v243_v11 }
 0x143   :  { %694 = vmatmul.mubr.f32.gmra.mrb[10].mxu1 %v639_v10 }
 0x144   :  { %v642_v12 = vpop.f32.mrb[12].mxu0 }
 0x145   :  { %v253_v13 = vpop.f32.mrb[13].mxu0 }
 0x146   :  { %696 = vmatprep.mubr.f32.mxu1 %v253_v13 }
 0x147   :  { %697 = vmatmul.mubr.f32.gmra.mrb[12].mxu1 %v642_v12 }
 0x148   :  { %v645_v14 = vpop.f32.mrb[14].mxu0 }
 0x149   :  { %v263_v15 = vpop.f32.mrb[15].mxu0 }
 0x14a   :  { %699 = vmatprep.mubr.f32.mxu1 %v263_v15 }
 0x14b   :  { %700 = vmatmul.mubr.f32.gmra.mrb[14].mxu1 %v645_v14 }
 0x202   :  { %v680_v17 = vpop.f32.mrb[0].mxu1 }
 0x203   :  { %v418_v18 = vadd.f32 %v680_v17, %v525_v16  ;;  %v412_v19 = vpop.f32.mrb[1].mxu1 }
 0x204   :  { %v413_v20 = vadd.f32 %v525_v16, %v412_v19 }
 0x205   :  { %492 = vst [vmem:[#allocation9 + $0x8] sm:$0xff] %v418_v18 }
 0x206   :  { %491 = vst [vmem:[#allocation9] sm:$0xff] %v413_v20  ;;  %v683_v21 = vpop.f32.mrb[2].mxu1 }
 0x207   :  { %v428_v22 = vadd.f32 %v683_v21, %v525_v16  ;;  %v422_v23 = vpop.f32.mrb[3].mxu1 }
 0x208   :  { %v423_v24 = vadd.f32 %v525_v16, %v422_v23 }
 0x209   :  { %494 = vst [vmem:[#allocation9 + $0x18] sm:$0xff] %v428_v22 }
 0x20a   :  { %493 = vst [vmem:[#allocation9 + $0x10] sm:$0xff] %v423_v24  ;;  %v686_v25 = vpop.f32.mrb[4].mxu1 }
 0x20b   :  { %v438_v26 = vadd.f32 %v686_v25, %v525_v16  ;;  %v432_v27 = vpop.f32.mrb[5].mxu1 }
 0x20c   :  { %v433_v28 = vadd.f32 %v525_v16, %v432_v27 }
 0x20d   :  { %496 = vst [vmem:[#allocation9 + $0x28] sm:$0xff] %v438_v26 }
 0x20e   :  { %495 = vst [vmem:[#allocation9 + $0x20] sm:$0xff] %v433_v28  ;;  %v689_v29 = vpop.f32.mrb[6].mxu1 }
 0x20f   :  { %v448_v30 = vadd.f32 %v689_v29, %v525_v16  ;;  %v442_v31 = vpop.f32.mrb[7].mxu1 }
 0x210   :  { %v443_v32 = vadd.f32 %v525_v16, %v442_v31 }
 0x211   :  { %498 = vst [vmem:[#allocation9 + $0x38] sm:$0xff] %v448_v30 }
 0x212   :  { %497 = vst [vmem:[#allocation9 + $0x30] sm:$0xff] %v443_v32  ;;  %v692_v33 = vpop.f32.mrb[8].mxu1 }
 0x213   :  { %v458_v34 = vadd.f32 %v692_v33, %v525_v16  ;;  %v452_v35 = vpop.f32.mrb[9].mxu1 }
 0x214   :  { %v453_v36 = vadd.f32 %v525_v16, %v452_v35 }
 0x215   :  { %500 = vst [vmem:[#allocation9 + $0x48] sm:$0xff] %v458_v34 }
 0x216   :  { %499 = vst [vmem:[#allocation9 + $0x40] sm:$0xff] %v453_v36  ;;  %v695_v37 = vpop.f32.mrb[10].mxu1 }
 0x217   :  { %v468_v38 = vadd.f32 %v695_v37, %v525_v16  ;;  %v462_v39 = vpop.f32.mrb[11].mxu1 }
 0x218   :  { %v463_v40 = vadd.f32 %v525_v16, %v462_v39 }
 0x219   :  { %502 = vst [vmem:[#allocation9 + $0x58] sm:$0xff] %v468_v38 }
 0x21a   :  { %501 = vst [vmem:[#allocation9 + $0x50] sm:$0xff] %v463_v40  ;;  %v698_v41 = vpop.f32.mrb[12].mxu1 }
 0x21b   :  { %v478_v42 = vadd.f32 %v698_v41, %v525_v16  ;;  %v472_v43 = vpop.f32.mrb[13].mxu1 }
 0x21c   :  { %v473_v44 = vadd.f32 %v525_v16, %v472_v43 }
 0x21d   :  { %504 = vst [vmem:[#allocation9 + $0x68] sm:$0xff] %v478_v42 }
 0x21e   :  { %503 = vst [vmem:[#allocation9 + $0x60] sm:$0xff] %v473_v44  ;;  %v701_v45 = vpop.f32.mrb[14].mxu1 }
 0x21f   :  { %v488_v46 = vadd.f32 %v701_v45, %v525_v16  ;;  %v482_v47 = vpop.f32.mrb[15].mxu1 }
 0x220   :  { %v483_v48 = vadd.f32 %v525_v16, %v482_v47 }
 0x221   :  { %506 = vst [vmem:[#allocation9 + $0x78] sm:$0xff] %v488_v46 }
 0x222   :  { %505 = vst [vmem:[#allocation9 + $0x70] sm:$0xff] %v483_v48 }
 0x223   :  { %849 = shalt.err (!%p846_p0)
}
 0x224   :  { %s850_s6 = scalar_lea.hbm %s971_s4, 2048 }
 0x225   :  { %p851_p1 = scmp.ne.s32.totalorder %s971_s4, %s850_s6  ;;  %p854_p2 = scmp.lt.u32.totalorder %s850_s6, %s971_s4 }
 0x227   :  { %p856_p3 = pnand %p854_p2, %p851_p1 }
 0x229   :  { %859 = shalt.err (!%p856_p3)
}
 0x22a   :  { %518 = dma.vmem_to_hbm [thread:$0]  %s513_s26, 2048, %s971_s4, [#allocation5], %s868_s27, %s868_s27, %s869_s28  }
 0x22b   :  { %864 = dma.done.wait [#allocation5], 2048  }
 0x22c   :  { %865 = vsyncadd [#allocation5], 4294965248 }
 0x22d   :  { %522 = vsyncpa [#allocation4], 1 }
 0x22e   :  { %523 = vsyncpa [#allocation7], 1 }
 0x22f   :  { %524 = vsyncpa [#allocation5], 1 }

</bundles_post_ra>
